<compile_context>
chip_gen: v7x
topology: tpu7x:2x2x1
jax: 0.10.0
libtpu: 0.0.40
codegen_flags: <defaults>
</compile_context>

<pallas_src>
import functools

import jax
import jax.numpy as jnp
from jax.experimental import pallas as pl
from jax.experimental.pallas import tpu as pltpu

PAD_ID = 0  # pad_id global used by the original module

_CHUNK_W = 512        # lanes of x processed per inner step (x loaded once per chunk)
_UNROLL_CHUNKS = 8    # python-unroll the chunk loop when it is this short


# ----------------------------- Pallas kernel -------------------------------- #
def _topcache_loss_kernel(x_ref, ci_ref, cp_ref, out_ref, *, inv_T, n_rows):
    # x_ref  : (tn, V)      model logits tile (input dtype, e.g. f32 or bf16)
    # ci_ref : (tn, K)      i32  cache indices gathered by gold (assumed in [0, V))
    # cp_ref : (tn, K)      f32  cache probabilities (renormalised + pad-masked)
    # out_ref: (1, 8, 128)  f32  per-tile partial KL sum, broadcast lane-dense
    ci = ci_ref[...]
    cp = cp_ref[...]

    tn, K = ci.shape
    V = x_ref.shape[-1]
    cw = min(_CHUNK_W, V)

    ci3 = ci[:, :, None]                                            # (tn, K, 1)
    # One small hoisted iota (1, 1, cw); per-chunk lane ids are base + start.
    base = jax.lax.broadcasted_iota(jnp.int32, (1, 1, cw), 2)

    def chunk_contrib(start, width):
        # x chunk is loaded from VMEM exactly once and compared against all K
        # indices while live; only the (tn, K) partial leaves the chunk.
        xc = x_ref[:, pl.ds(start, width)]                          # (tn, width)
        lane = (base if width == cw else base[:, :, :width]) + start
        match = ci3 == lane                                         # (tn, K, width)
        sel = jnp.where(match, xc[:, None, :].astype(jnp.float32), 0.0)
        return jnp.sum(sel, axis=-1)                                # (tn, K)

    num_full = V // cw
    rem = V - num_full * cw

    acc = jnp.zeros((tn, K), jnp.float32)
    if num_full <= _UNROLL_CHUNKS:
        for c in range(num_full):
            acc = acc + chunk_contrib(c * cw, cw)
    else:
        def body(c, a):
            return a + chunk_contrib(pl.multiple_of(c * cw, 128), cw)
        acc = jax.lax.fori_loop(0, num_full, body, acc)
    if rem:
        acc = acc + chunk_contrib(num_full * cw, rem)

    # exactly one lane matches per (row, k), so the masked sum is the gather
    m_s = acc * inv_T if inv_T != 1.0 else acc

    # log_softmax over the K gathered scores
    m_max = jnp.max(m_s, axis=-1, keepdims=True)
    z = m_s - m_max
    logp = z - jnp.log(jnp.sum(jnp.exp(z), axis=-1, keepdims=True))

    # kl_div(input=logp, target=cp, reduction='sum').  Zero targets contribute 0;
    # rows >= n_rows (ragged last tile: x block reads unspecified data, cp block
    # is zero-padded by the wrapper) are masked out explicitly as well.
    row = pl.program_id(0) * tn + jax.lax.broadcasted_iota(jnp.int32, (tn, 1), 0)
    take = (cp > 0.0) & (row < n_rows)
    safe_cp = jnp.where(take, cp, 1.0)
    kl = jnp.sum(jnp.where(take, cp * (jnp.log(safe_cp) - logp), 0.0))

    # Lane-dense per-tile partial sum (distinct block per grid step -> no
    # sequential accumulator; grid axis stays "parallel" for megacore / v7x).
    out_ref[...] = jnp.broadcast_to(kl, out_ref.shape).astype(out_ref.dtype)


# ------------------------------- wrappers ------------------------------------ #
def _vmem_budget_bytes():
    """~3/4 of per-core VMEM: ~96 MiB on v5e/v6e (128 MiB), ~48 MiB on v7x (64 MiB)."""
    try:
        cap = int(pltpu.get_tpu_info().vmem_capacity_bytes)
    except Exception:
        cap = 128 * 1024 * 1024
    return (3 * cap) // 4


def _pick_tile_n(N, V, K, itemsize, vmem_budget_bytes):
    """Largest row tile s.t. the explicit live buffers fit the VMEM budget:
    2 double-buffered x tiles + the fused per-chunk compare/select temporaries
    (K * chunk lanes, f32 + mask), capped at 1024 rows."""
    cw = min(_CHUNK_W, V)
    per_row = 2 * V * itemsize + 8 * K * cw + 256
    cand = (vmem_budget_bytes * 7 // 8) // max(per_row, 1)
    tile_n = int(max(8, min(1024, cand)))
    n_pad8 = ((N + 7) // 8) * 8
    tile_n = min(tile_n, max(8, n_pad8))
    tile_n = max(8, (tile_n // 8) * 8)
    return tile_n


def topcache_get_loss(x, gold, cache_index, cache_p, *, num_topk, T=1.0,
                      gold_pad_mask=None, tile_n=None, vmem_budget_bytes=None):
    B, S, V = x.shape
    N = B * S
    x2 = x.reshape(N, V)                       # view; the [N, V] logits are never copied/padded
    g = gold.reshape(N)
    if gold_pad_mask is None:
        gold_pad_mask = gold == PAD_ID
    pad = gold_pad_mask.reshape(N)

    # cache_index.index_select(0, gold).narrow(-1, 0, num_topk)  (tiny glue gather).
    # Indices are assumed to lie in [0, V), as torch.gather requires.
    c_i = cache_index[g, :num_topk].astype(jnp.int32)
    c_p = cache_p[g, :num_topk].astype(jnp.float32)
    # norm_func (L1 renorm of truncated top-K probs, guarded against a zero
    # denominator) + masked_fill of padded rows, folded into the wrapper.
    denom = jnp.sum(c_p, axis=-1, keepdims=True)
    c_p = jnp.where(denom > 0.0, c_p / jnp.where(denom > 0.0, denom, 1.0), 0.0)
    c_p = jnp.where(pad[:, None], 0.0, c_p)

    if vmem_budget_bytes is None:
        vmem_budget_bytes = _vmem_budget_bytes()
    if tile_n is None:
        tile_n = _pick_tile_n(N, V, num_topk, x2.dtype.itemsize, vmem_budget_bytes)
    else:
        tile_n = max(8, (int(tile_n) // 8) * 8)

    # Grid covers N with a ragged last tile for x (no full-array pad of x).
    # Only the tiny [*, K] side inputs are zero-padded so ragged rows carry
    # cp == 0; the kernel additionally masks rows >= N.
    G = pl.cdiv(N, tile_n)
    Np = G * tile_n
    if Np != N:
        c_i = jnp.pad(c_i, ((0, Np - N), (0, 0)))
        c_p = jnp.pad(c_p, ((0, Np - N), (0, 0)))

    inv_T = float(1.0 / T)

    partials = pl.pallas_call(
        functools.partial(_topcache_loss_kernel, inv_T=inv_T, n_rows=N),
        out_shape=jax.ShapeDtypeStruct((G, 8, 128), jnp.float32),
        grid_spec=pltpu.PrefetchScalarGridSpec(
            num_scalar_prefetch=0,
            grid=(G,),
            in_specs=[
                pl.BlockSpec((tile_n, V), lambda i: (i, 0)),
                pl.BlockSpec((tile_n, num_topk), lambda i: (i, 0)),
                pl.BlockSpec((tile_n, num_topk), lambda i: (i, 0)),
            ],
            out_specs=pl.BlockSpec((1, 8, 128), lambda i: (i, 0, 0)),
        ),
        compiler_params=pltpu.CompilerParams(
            dimension_semantics=("parallel",),
            vmem_limit_bytes=int(vmem_budget_bytes),
        ),
    )(x2, c_i, c_p)

    return jnp.sum(partials[:, 0, 0])


def topcache_forward(x, gold, cache_index, cache_p, *, num_topk, T=1.0,
                     gold_pad_mask=None, update_cache=True,
                     warm_cache_steps=0, cache_update_steps=0):
    compute_loss = cache_update_steps >= warm_cache_steps
    pad_mask = None
    if compute_loss or update_cache:
        pad_mask = (gold == PAD_ID) if gold_pad_mask is None else gold_pad_mask
    if compute_loss:
        loss = topcache_get_loss(x, gold, cache_index, cache_p,
                                 num_topk=num_topk, T=T, gold_pad_mask=pad_mask)
    else:
        loss = jnp.zeros((), jnp.float32)   # dtype-consistent with the kernel path
    # TODO(synk): update_cache (sparse COO coalesce + moving average) not implemented.
    return loss


def init_cache(vsize, num_cache_topk, p, num_topk):
    """Deterministic stand-in for init_cache: row v -> [v, v+1, ...] with gold prob p."""
    v = jnp.arange(vsize, dtype=jnp.int32)
    offs = jnp.arange(num_cache_topk, dtype=jnp.int32)
    idx = (v[:, None] + offs[None, :]) % vsize
    rest = (1.0 - p) / float(num_cache_topk - 1)
    probs = jnp.full((vsize, num_cache_topk), rest, jnp.float32).at[:, 0].set(p)
    return idx, probs


# --------------------------- pure-JAX reference ------------------------------ #
def _ref_loss(x, gold, cache_index, cache_p, num_topk, T):
    B, S, V = x.shape
    N = B * S
    g = gold.reshape(N)
    pad = g == PAD_ID
    ci = cache_index[g, :num_topk]
    cp = cache_p[g, :num_topk].astype(jnp.float32)
    denom = cp.sum(-1, keepdims=True)
    cp = jnp.where(denom > 0.0, cp / jnp.where(denom > 0.0, denom, 1.0), 0.0)
    cp = jnp.where(pad[:, None], 0.0, cp)
    ms = jnp.take_along_axis(x.reshape(N, V).astype(jnp.float32), ci, axis=-1)
    if T != 1.0:
        ms = ms / T
    logp = jax.nn.log_softmax(ms, axis=-1)
    safe = jnp.where(cp > 0.0, cp, 1.0)
    return jnp.sum(jnp.where(cp > 0.0, cp * (jnp.log(safe) - logp), 0.0))


if __name__ == "__main__":
    key = jax.random.PRNGKey(0)
    B, S, V = 2, 8, 512
    num_topk, num_cache_topk = 8, 16
    min_gold_p = 0.7
    T = 1.0

    k1, k2 = jax.random.split(key)
    x = jax.random.normal(k1, (B, S, V), dtype=jnp.float32)
    gold = jax.random.randint(k2, (B, S), 0, V, dtype=jnp.int32)
    gold = gold.at[0, 0].set(PAD_ID)  # ensure at least one padded position

    cache_index, cache_p = init_cache(V, num_cache_topk, min_gold_p, num_topk)

    loss = topcache_forward(x, gold, cache_index, cache_p, num_topk=num_topk, T=T)
    loss = jax.block_until_ready(loss)

    ref = _ref_loss(x, gold, cache_index, cache_p, num_topk, T)
    assert jnp.allclose(loss, ref, rtol=1e-4, atol=1e-4), (loss, ref)

    print("KERNEL_OK")
</pallas_src>

<mosaic_0001>
module attributes {stable_mosaic.version = 11 : i64} {
  func.func @_topcache_loss_kernel(%arg0: i32, %arg1: memref<16x512xf32, #tpu.memory_space<vmem>>, %arg2: memref<16x8xi32, #tpu.memory_space<vmem>>, %arg3: memref<16x8xf32, #tpu.memory_space<vmem>>, %arg4: memref<1x8x128xf32, #tpu.memory_space<vmem>>) attributes {dimension_semantics = [#tpu.dimension_semantics<parallel>], iteration_bounds = array<i64: 1>, scalar_prefetch = 0 : i64, scratch_operands = 0 : i64, tpu.core_type = #tpu.core_type<tc>, window_params = [{transform_indices = @transform_0, window_bounds = array<i64: 16, 512>}, {transform_indices = @transform_1, window_bounds = array<i64: 16, 8>}, {transform_indices = @transform_2, window_bounds = array<i64: 16, 8>}, {transform_indices = @transform_3, window_bounds = array<i64: 1, 8, 128>}]} {
    %c0 = arith.constant 0 : index
    %c0_0 = arith.constant 0 : index
    %0 = vector.load %arg2[%c0, %c0_0] : memref<16x8xi32, #tpu.memory_space<vmem>>, vector<16x8xi32>
    %c0_1 = arith.constant 0 : index
    %c0_2 = arith.constant 0 : index
    %1 = vector.load %arg3[%c0_1, %c0_2] : memref<16x8xf32, #tpu.memory_space<vmem>>, vector<16x8xf32>
    %2 = vector.shape_cast %0 : vector<16x8xi32> to vector<16x8x1xi32>
    %3 = tpu.iota {dimensions = array<i32: 2>} : vector<1x1x512xi32>
    %cst = arith.constant 0.000000e+00 : f32
    %4 = vector.broadcast %cst : f32 to vector<16x8xf32>
    %c0_3 = arith.constant 0 : index
    %c0_4 = arith.constant 0 : index
    %5 = vector.load %arg1[%c0_3, %c0_4] : memref<16x512xf32, #tpu.memory_space<vmem>>, vector<16x512xf32>
    %c0_i32 = arith.constant 0 : i32
    %6 = vector.broadcast %c0_i32 : i32 to vector<1x1x512xi32>
    %7 = arith.addi %3, %6 : vector<1x1x512xi32>
    %8 = vector.broadcast %2 : vector<16x8x1xi32> to vector<16x8x512xi32>
    %9 = vector.broadcast %7 : vector<1x1x512xi32> to vector<16x8x512xi32>
    %10 = arith.cmpi eq, %8, %9 : vector<16x8x512xi32>
    %11 = vector.shape_cast %5 : vector<16x512xf32> to vector<16x1x512xf32>
    %cst_5 = arith.constant 0.000000e+00 : f32
    %12 = vector.shape_cast %11 : vector<16x1x512xf32> to vector<16x1x512xf32>
    %13 = vector.broadcast %12 : vector<16x1x512xf32> to vector<16x8x512xf32>
    %14 = vector.broadcast %cst_5 : f32 to vector<16x8x512xf32>
    %15 = arith.select %10, %13, %14 : vector<16x8x512xi1>, vector<16x8x512xf32>
    %cst_6 = arith.constant dense<0.000000e+00> : vector<16x8xf32>
    %16 = vector.multi_reduction <add>, %15, %cst_6 [2] : vector<16x8x512xf32> to vector<16x8xf32>
    %17 = arith.addf %4, %16 : vector<16x8xf32>
    %cst_7 = arith.constant dense<0xFF800000> : vector<16xf32>
    %18 = vector.multi_reduction <maximumf>, %17, %cst_7 [1] : vector<16x8xf32> to vector<16xf32>
    %19 = vector.shape_cast %18 : vector<16xf32> to vector<16x1xf32>
    %20 = vector.broadcast %19 : vector<16x1xf32> to vector<16x8xf32>
    %21 = arith.subf %17, %20 : vector<16x8xf32>
    %22 = math.exp %21 : vector<16x8xf32>
    %cst_8 = arith.constant dense<0.000000e+00> : vector<16xf32>
    %23 = vector.multi_reduction <add>, %22, %cst_8 [1] : vector<16x8xf32> to vector<16xf32>
    %24 = vector.shape_cast %23 : vector<16xf32> to vector<16x1xf32>
    %25 = math.log %24 : vector<16x1xf32>
    %26 = vector.broadcast %25 : vector<16x1xf32> to vector<16x8xf32>
    %27 = arith.subf %21, %26 : vector<16x8xf32>
    %c16_i32 = arith.constant 16 : i32
    %28 = arith.muli %arg0, %c16_i32 : i32
    %29 = tpu.iota {dimensions = array<i32: 0>} : vector<16x1xi32>
    %30 = vector.broadcast %28 : i32 to vector<16x1xi32>
    %31 = arith.addi %30, %29 : vector<16x1xi32>
    %cst_9 = arith.constant 0.000000e+00 : f32
    %32 = vector.broadcast %cst_9 : f32 to vector<16x8xf32>
    %33 = arith.cmpf ogt, %1, %32 : vector<16x8xf32>
    %c16_i32_10 = arith.constant 16 : i32
    %34 = vector.broadcast %c16_i32_10 : i32 to vector<16x1xi32>
    %35 = arith.cmpi slt, %31, %34 : vector<16x1xi32>
    %36 = vector.broadcast %35 : vector<16x1xi1> to vector<16x8xi1>
    %37 = arith.andi %33, %36 : vector<16x8xi1>
    %cst_11 = arith.constant 1.000000e+00 : f32
    %38 = vector.broadcast %cst_11 : f32 to vector<16x8xf32>
    %39 = arith.select %37, %1, %38 : vector<16x8xi1>, vector<16x8xf32>
    %40 = math.log %39 : vector<16x8xf32>
    %41 = arith.subf %40, %27 : vector<16x8xf32>
    %42 = arith.mulf %1, %41 : vector<16x8xf32>
    %cst_12 = arith.constant 0.000000e+00 : f32
    %43 = vector.broadcast %cst_12 : f32 to vector<16x8xf32>
    %44 = arith.select %37, %42, %43 : vector<16x8xi1>, vector<16x8xf32>
    %45 = vector.shape_cast %44 : vector<16x8xf32> to vector<1x16x8xf32>
    %cst_13 = arith.constant dense<0.000000e+00> : vector<1xf32>
    %46 = vector.multi_reduction <add>, %45, %cst_13 [1, 2] : vector<1x16x8xf32> to vector<1xf32>
    %47 = vector.shape_cast %46 : vector<1xf32> to vector<1x1x1xf32>
    %48 = vector.extract %47[0, 0, 0] : f32 from vector<1x1x1xf32>
    %49 = vector.broadcast %48 : f32 to vector<1x8x128xf32>
    %c0_14 = arith.constant 0 : index
    %c0_15 = arith.constant 0 : index
    %c0_16 = arith.constant 0 : index
    %50 = vector.load %arg4[%c0_14, %c0_15, %c0_16] : memref<1x8x128xf32, #tpu.memory_space<vmem>>, vector<1x8x128xf32>
    tpu.vector_store %arg4[%c0_14, %c0_15, %c0_16], %49 {strides = array<i32>} : memref<1x8x128xf32, #tpu.memory_space<vmem>>, vector<1x8x128xf32>,
    return
  }
  func.func @transform_0(%arg0: i32) -> (i32, i32) {
    %c0_i32 = arith.constant 0 : i32
    %c0_i32_0 = arith.constant 0 : i32
    return %arg0, %c0_i32 : i32, i32
  }
  func.func @transform_1(%arg0: i32) -> (i32, i32) {
    %c0_i32 = arith.constant 0 : i32
    %c0_i32_0 = arith.constant 0 : i32
    return %arg0, %c0_i32 : i32, i32
  }
  func.func @transform_2(%arg0: i32) -> (i32, i32) {
    %c0_i32 = arith.constant 0 : i32
    %c0_i32_0 = arith.constant 0 : i32
    return %arg0, %c0_i32 : i32, i32
  }
  func.func @transform_3(%arg0: i32) -> (i32, i32, i32) {
    %c0_i32 = arith.constant 0 : i32
    %c0_i32_0 = arith.constant 0 : i32
    %c0_i32_1 = arith.constant 0 : i32
    return %arg0, %c0_i32, %c0_i32_0 : i32, i32, i32
  }
}

</mosaic_0001>

<bundles_post_ra>
// kernel: tpu_custom_call.1
= control target key start
LH: loop header
LB: loop body
LE: loop exit
PB: predicated region body
PF: predicated region fallthrough
CT: control target
= control target key end

     0   :  { %8 = vsyncpa [#allocation3], 0  ;;  %s2712_s0 = inlined_call_operand.hbm [shape: f32[16,512], index: 0, kind: input, shape index: {}]   ;;  %s2713_s1 = inlined_call_operand.hbm [shape: s32[16,8], index: 1, kind: input, shape index: {}]   ;;  %s2714_s2 = inlined_call_operand.hbm [shape: f32[16,8], index: 2, kind: input, shape index: {}]   ;;  %s2715_s3 = inlined_call_operand.hbm [shape: f32[1,8,128], index: 3, kind: output, shape index: {}]  }
   0x1   :  { %9 = vsyncpa [#allocation6], 0 }
   0x2   :  { %10 = vsyncpa [#allocation4], 0  ;;  %s1728_s12 = smov [#allocation5]   ;;  %s1634_s16 = scalar_lea.hbm %s2713_s1, 256 }
   0x3   :  { %s28_s13 = sshll.u32 %s1728_s12, 4  ;;  %p1635_p0 = scmp.ne.s32.totalorder %s2713_s1, %s1634_s16  ;;  %s29_s13 = int_to_ptr.vmem [resolvable:$true] %s28_s13 }
   0x4   :  { %p1638_p1 = scmp.lt.u32.totalorder %s1634_s16, %s2713_s1 }
   0x6   :  { %p1640_p2 = pnand %p1638_p1, %p1635_p0 }
   0x8   :  { %1643 = shalt.err (!%p1640_p2)
}
   0x9   :  { %s1644_s21 = scalar_lea.vmem %s29_s13, 256  ;;  %p1649_p4 = scmp.lt.s32.totalorder %s29_s13, %s29_s13 }
   0xa   :  { %p1645_p3 = scmp.ne.s32.totalorder %s29_s13, %s1644_s21  ;;  %p1650_p5 = scmp.lt.s32.totalorder %s1644_s21, %s1644_s21 }
   0xc   :  { %p1651_p6 = por %p1650_p5, %p1649_p4 }
   0xe   :  { %p1652_p7 = pnand %p1651_p6, %p1645_p3 }
  0x10   :  { %1655 = shalt.err (!%p1652_p7)
}
  0x11   :  { %s1729_s22 = smov 128   ;;  %s1730_s23 = smov 8  }
  0x12   :  { %34 = dma.hbm_to_vmem [thread:$0]  %s2713_s1, 256, %s29_s13, [#allocation6], %s1729_s22, %s1729_s22, %s1730_s23  }
  0x13   :  { %s1731_s26 = smov [#allocation2]   ;;  %s1656_s30 = scalar_lea.hbm %s2712_s0, 1024 }
  0x14   :  { %s16_s27 = sshll.u32 %s1731_s26, 4  ;;  %p1657_p8 = scmp.ne.s32.totalorder %s2712_s0, %s1656_s30  ;;  %s17_s27 = int_to_ptr.vmem [resolvable:$true] %s16_s27 }
  0x15   :  { %p1660_p9 = scmp.lt.u32.totalorder %s1656_s30, %s2712_s0 }
  0x17   :  { %p1662_p10 = pnand %p1660_p9, %p1657_p8 }
  0x19   :  { %1665 = shalt.err (!%p1662_p10)
}
  0x1a   :  { %s1666_s8 = scalar_lea.vmem %s17_s27, 1024  ;;  %p1671_p12 = scmp.lt.s32.totalorder %s17_s27, %s17_s27 }
  0x1b   :  { %p1667_p11 = scmp.ne.s32.totalorder %s17_s27, %s1666_s8  ;;  %p1672_p13 = scmp.lt.s32.totalorder %s1666_s8, %s1666_s8 }
  0x1d   :  { %p1673_p0 = por %p1672_p13, %p1671_p12 }
  0x1f   :  { %p1674_p1 = pnand %p1673_p0, %p1667_p11 }
  0x21   :  { %1677 = shalt.err (!%p1674_p1)
}
  0x22   :  { %s1732_s1 = smov 512   ;;  %s1733_s9 = smov 32  }
  0x23   :  { %22 = dma.hbm_to_vmem [thread:$0]  %s2712_s0, 1024, %s17_s27, [#allocation3], %s1732_s1, %s1732_s1, %s1733_s9  }
  0x24   :  { %s1734_s12 = smov [#allocation7]   ;;  %s1678_s16 = scalar_lea.hbm %s2714_s2, 256 }
  0x25   :  { %s40_s13 = sshll.u32 %s1734_s12, 4  ;;  %p1679_p2 = scmp.ne.s32.totalorder %s2714_s2, %s1678_s16  ;;  %s41_s13 = int_to_ptr.vmem [resolvable:$true] %s40_s13 }
  0x26   :  { %p1682_p3 = scmp.lt.u32.totalorder %s1678_s16, %s2714_s2 }
  0x28   :  { %p1684_p4 = pnand %p1682_p3, %p1679_p2 }
  0x2a   :  { %1687 = shalt.err (!%p1684_p4)
}
  0x2b   :  { %s1688_s21 = scalar_lea.vmem %s41_s13, 256  ;;  %p1693_p6 = scmp.lt.s32.totalorder %s41_s13, %s41_s13 }
  0x2c   :  { %p1689_p5 = scmp.ne.s32.totalorder %s41_s13, %s1688_s21  ;;  %p1694_p7 = scmp.lt.s32.totalorder %s1688_s21, %s1688_s21 }
  0x2e   :  { %p1695_p8 = por %p1694_p7, %p1693_p6 }
  0x30   :  { %p1696_p9 = pnand %p1695_p8, %p1689_p5 }
  0x32   :  { %1699 = shalt.err (!%p1696_p9)
}
  0x33   :  { %46 = dma.hbm_to_vmem [thread:$0]  %s2714_s2, 256, %s41_s13, [#allocation6], %s1729_s22, %s1729_s22, %s1730_s23  }
  0x34   :  { %1722 = dma.done.wait [#allocation3], 1024  }
  0x35   :  { %1723 = vsyncadd [#allocation3], 4294966272 }
  0x36   :  { %1724 = dma.done.wait [#allocation6], 512  }
  0x37   :  { %1725 = vsyncadd [#allocation6], 4294966784  ;;  %v60_v0 = vlaneseq  ;;  %v57_v4 = vld [vmem:[#allocation5 + $0x8] sm:$0xff]  ;;  %v56_v5 = vld [vmem:[#allocation5] sm:$0xff]  ;;  %v1735_v28 = vmov 1966171168  }
  0x38   :  { %v262_v29 = vunpack.c.l.s4 %v1735_v28  ;;  %v1582_v31 = vld [vmem:[#allocation2] ss:$8 sps:$4 sm:$0xff]   ;;  %v1584_v32 = vld [vmem:[#allocation2 + $0x10] ss:$8 sps:$4 sm:$0xff]   ;;  %v1590_v41 = vld [vmem:[#allocation2 + $0x4] ss:$8 sps:$4 sm:$0xff]  }
  0x39   :  { %v1800_v1 = vshrl.u32 %v60_v0, 7  ;;  %v1586_v34 = vld [vmem:[#allocation2 + $0x20] ss:$8 sps:$4 sm:$0xff]   ;;  %v1588_v35 = vld [vmem:[#allocation2 + $0x30] ss:$8 sps:$4 sm:$0xff]   ;;  %v1849_v44 = vand.u32 127, %v60_v0 }
  0x3a   :  { %v263_v30 = vunpack.c.0.s8 %v262_v29  ;;  %v1591_v42 = vld [vmem:[#allocation2 + $0x14] ss:$8 sps:$4 sm:$0xff]   ;;  %v1592_v46 = vld [vmem:[#allocation2 + $0x24] ss:$8 sps:$4 sm:$0xff]   ;;  %s1737_s2 = smov [#allocation8]  }
  0x3b   :  { %v1803_v2 = vsub.s32 0, %v1800_v1  ;;  %v1806_v3 = vsub.s32 1, %v1800_v1  ;;  %v1813_v10 = vsub.s32 2, %v1800_v1  ;;  %v1818_v13 = vsub.s32 3, %v1800_v1  ;;  %v1593_v47 = vld [vmem:[#allocation2 + $0x34] ss:$8 sps:$4 sm:$0xff]  }
  0x3c   :  { %v1823_v16 = vsub.s32 4, %v1800_v1  ;;  %v1828_v19 = vsub.s32 5, %v1800_v1  ;;  %v1833_v22 = vsub.s32 6, %v1800_v1  ;;  %v1838_v25 = vsub.s32 7, %v1800_v1  ;;  %s1558_s22 = sshll.u32 %s1737_s2, 4  ;;  %s1559_s22 = int_to_ptr.vmem [resolvable:$true] %s1558_s22 }
  0x3d   :  { %v119_v6 = vrot.slane %v57_v4, %v1803_v2  ;;  %v63_v7 = vrot.slane %v56_v5, %v1803_v2  ;;  %v126_v8 = vrot.slane %v57_v4, %v1806_v3  ;;  %v70_v9 = vrot.slane %v56_v5, %v1806_v3  ;;  %s1700_s25 = scalar_lea.vmem %s1559_s22, 128  ;;  %p1705_p11 = scmp.lt.s32.totalorder %s1559_s22, %s1559_s22 }
  0x3e   :  { %v133_v11 = vrot.slane %v57_v4, %v1813_v10  ;;  %v77_v12 = vrot.slane %v56_v5, %v1813_v10  ;;  %v140_v14 = vrot.slane %v57_v4, %v1818_v13  ;;  %v84_v15 = vrot.slane %v56_v5, %v1818_v13  ;;  %p1701_p10 = scmp.ne.s32.totalorder %s1559_s22, %s1700_s25  ;;  %p1706_p12 = scmp.lt.s32.totalorder %s1700_s25, %s1700_s25 }
  0x3f   :  { %121 = vbcast.lane.b32.xlu1 %v119_v6, 256  ;;  %65 = vbcast.lane.b32.xlu0 %v63_v7, 256  ;;  %v147_v17 = vrot.slane %v57_v4, %v1823_v16  ;;  %v91_v18 = vrot.slane %v56_v5, %v1823_v16  ;;  %v154_v20 = vrot.slane %v57_v4, %v1828_v19  ;;  %v1860_v53 = vadd.s32 128, %v1849_v44 }
  0x40   :  { %v98_v21 = vrot.slane %v56_v5, %v1828_v19  ;;  %v161_v23 = vrot.slane %v57_v4, %v1833_v22  ;;  %v105_v24 = vrot.slane %v56_v5, %v1833_v22  ;;  %v168_v26 = vrot.slane %v57_v4, %v1838_v25  ;;  %p1707_p13 = por %p1706_p12, %p1705_p11 }
  0x41   :  { %v112_v27 = vrot.slane %v56_v5, %v1838_v25  ;;  %v1843_v33 = vsub.s32 %v263_v30, %v1800_v1  ;;  %v1866_v55 = vadd.s32 256, %v1849_v44  ;;  %v1869_v56 = vadd.s32 384, %v1849_v44 }
  0x42   :  { %p1708_p0 = pnand %p1707_p13, %p1701_p10 }
  0x43   :  { %128 = vbcast.lane.b32.xlu1 %v126_v8, 256  ;;  %72 = vbcast.lane.b32.xlu0 %v70_v9, 256  ;;  %v267_v36 = vrot.slane %v1582_v31, %v1843_v33  ;;  %v281_v37 = vrot.slane %v1584_v32, %v1843_v33  ;;  %v335_v38 = vrot.slane %v1586_v34, %v1843_v33 }
  0x44   :  { %v349_v39 = vrot.slane %v1588_v35, %v1843_v33  ;;  %v274_v50 = vrot.slane %v1590_v41, %v1843_v33  ;;  %v288_v51 = vrot.slane %v1591_v42, %v1843_v33  ;;  %v342_v57 = vrot.slane %v1592_v46, %v1843_v33 }
  0x45   :  { %v289_v40 = vcombine.low %v267_v36, %v281_v37  ;;  %v290_v45 = vcombine.high %v267_v36, %v281_v37  ;;  %v356_v58 = vrot.slane %v1593_v47, %v1843_v33 }
  0x46   :  { %v357_v43 = vcombine.low %v335_v38, %v349_v39  ;;  %v358_v49 = vcombine.high %v335_v38, %v349_v39  ;;  %v291_v62 = vcombine.low %v274_v50, %v288_v51  ;;  %v292_v36 = vcombine.high %v274_v50, %v288_v51 }
  0x47   :  { %135 = vbcast.lane.b32.xlu1 %v133_v11, 256  ;;  %79 = vbcast.lane.b32.xlu0 %v77_v12, 256  ;;  %v1852_v48 = vrot.slane %v289_v40, %v1843_v33  ;;  %v1863_v54 = vrot.slane %v290_v45, %v1843_v33  ;;  %v360_v40 = vcombine.high %v342_v57, %v356_v58 }
  0x48   :  { %v1857_v52 = vrot.slane %v357_v43, %v1843_v33  ;;  %v1878_v61 = vrot.slane %v358_v49, %v1843_v33 }
  0x49   :  { %v396_v59 = vrot.slane %v1852_v48, %v1803_v2  ;;  %v400_v60 = vrot.slane %v1852_v48, %v1806_v3  ;;  %v404_v63 = vrot.slane %v1852_v48, %v1813_v10  ;;  %v408_v0 = vrot.slane %v1852_v48, %v1818_v13 }
  0x4a   :  { %v524_v4 = vrot.slane %v1857_v52, %v1803_v2  ;;  %v528_v5 = vrot.slane %v1857_v52, %v1806_v3  ;;  %v532_v6 = vrot.slane %v1857_v52, %v1813_v10  ;;  %v536_v7 = vrot.slane %v1857_v52, %v1818_v13 }
  0x4b   :  { %142 = vbcast.lane.b32.xlu1 %v140_v14, 256  ;;  %86 = vbcast.lane.b32.xlu0 %v84_v15, 256  ;;  %v412_v8 = vrot.slane %v1863_v54, %v1803_v2  ;;  %v1896_v9 = vcombine.high %v1852_v48, %v1852_v48  ;;  %v416_v11 = vrot.slane %v1863_v54, %v1806_v3 }
  0x4c   :  { %v420_v12 = vrot.slane %v1863_v54, %v1813_v10  ;;  %v424_v14 = vrot.slane %v1863_v54, %v1818_v13  ;;  %v1906_v15 = vcombine.high %v1857_v52, %v1857_v52  ;;  %v1982_v51 = vrot.slane %v360_v40, %v1843_v33 }
  0x4d   :  { %v428_v28 = vrot.slane %v1896_v9, %v1803_v2  ;;  %v432_v29 = vrot.slane %v1896_v9, %v1806_v3  ;;  %v436_v30 = vrot.slane %v1896_v9, %v1813_v10  ;;  %v440_v31 = vrot.slane %v1896_v9, %v1818_v13 }
  0x4e   :  { %v556_v32 = vrot.slane %v1906_v15, %v1803_v2  ;;  %v560_v34 = vrot.slane %v1906_v15, %v1806_v3  ;;  %v564_v35 = vrot.slane %v1906_v15, %v1813_v10  ;;  %v568_v37 = vrot.slane %v1906_v15, %v1818_v13 }
  0x4f   :  { %149 = vbcast.lane.b32.xlu1 %v147_v17, 256  ;;  %93 = vbcast.lane.b32.xlu0 %v91_v18, 256  ;;  %v540_v17 = vrot.slane %v1878_v61, %v1803_v2  ;;  %v544_v18 = vrot.slane %v1878_v61, %v1806_v3 }
  0x53   :  { %156 = vbcast.lane.b32.xlu1 %v154_v20, 256  ;;  %100 = vbcast.lane.b32.xlu0 %v98_v21, 256  ;;  %v1914_v20 = vcombine.high %v1863_v54, %v1863_v54  ;;  %v359_v21 = vcombine.low %v342_v57, %v356_v58 }
  0x55   :  { %v444_v38 = vrot.slane %v1914_v20, %v1803_v2  ;;  %v1946_v39 = vrot.slane %v359_v21, %v1843_v33  ;;  %v448_v41 = vrot.slane %v1914_v20, %v1806_v3 }
  0x57   :  { %163 = vbcast.lane.b32.xlu1 %v161_v23, 256  ;;  %107 = vbcast.lane.b32.xlu0 %v105_v24, 256  ;;  %v548_v23 = vrot.slane %v1878_v61, %v1813_v10  ;;  %v552_v24 = vrot.slane %v1878_v61, %v1818_v13  ;;  %v1992_v21 = vcombine.high %v1946_v39, %v1946_v39 }
  0x5b   :  { %170 = vbcast.lane.b32.xlu1 %v168_v26, 256  ;;  %114 = vbcast.lane.b32.xlu0 %v112_v27, 256  ;;  %v1922_v26 = vcombine.high %v1878_v61, %v1878_v61  ;;  %v1925_v27 = vrot.slane %v291_v62, %v1843_v33  ;;  %v1973_v62 = vrot.slane %v292_v36, %v1843_v33 }
  0x5c   :  { %v2028_v33 = vcombine.high %v1982_v51, %v1982_v51 }
  0x5d   :  { %v1956_v45 = vcombine.high %v1925_v27, %v1925_v27  ;;  %v2002_v57 = vcombine.high %v1973_v62, %v1973_v62 }
  0x5e   :  { %v636_v49 = vrot.slane %v2028_v33, %v1803_v2 }
  0xb1   :  { %v122_v40 = vpop.permute.xlu1 %121  ;;  %v66_v46 = vpop.permute.xlu0 %65 }
  0xb2   :  { %vm217_vm0 = vcmp.eq.s32.totalorder %v122_v40, %v1849_v44  ;;  %vm218_vm1 = vcmp.eq.s32.totalorder %v122_v40, %v1860_v53  ;;  %vm185_vm2 = vcmp.eq.s32.totalorder %v66_v46, %v1849_v44  ;;  %vm186_vm3 = vcmp.eq.s32.totalorder %v66_v46, %v1860_v53 }
  0xb3   :  { %vm187_vm4 = vcmp.eq.s32.totalorder %v66_v46, %v1866_v55  ;;  %vm188_vm5 = vcmp.eq.s32.totalorder %v66_v46, %v1869_v56  ;;  %v713_v36 = vsel %vm185_vm2, %v396_v59, 0.0  ;;  %v714_v50 = vsel %vm186_vm3, %v400_v60, 0.0 }
  0xb4   :  { %v777_v58 = vadd.f32 %v714_v50, %v713_v36  ;;  %vm219_vm6 = vcmp.eq.s32.totalorder %v122_v40, %v1866_v55  ;;  %v715_v46 = vsel %vm187_vm4, %v404_v63, 0.0  ;;  %v745_v59 = vsel %vm217_vm0, %v524_v4, 0.0 }
  0xb5   :  { %v129_v43 = vpop.permute.xlu1 %128  ;;  %v73_v42 = vpop.permute.xlu0 %72  ;;  %v746_v60 = vsel %vm218_vm1, %v528_v5, 0.0  ;;  %v640_v50 = vrot.slane %v2028_v33, %v1806_v3  ;;  %v716_v36 = vsel %vm188_vm5, %v408_v0, 0.0  ;;  %v747_v63 = vsel %vm219_vm6, %v532_v6, 0.0 }
  0xb6   :  { %vm189_vm7 = vcmp.eq.s32.totalorder %v73_v42, %v1849_v44  ;;  %vm190_vm8 = vcmp.eq.s32.totalorder %v73_v42, %v1860_v53  ;;  %v778_v4 = vadd.f32 %v777_v58, %v715_v46  ;;  %vm220_vm9 = vcmp.eq.s32.totalorder %v122_v40, %v1869_v56 }
  0xb7   :  { %v817_v47 = vadd.f32 %v746_v60, %v745_v59  ;;  %vm191_vm10 = vcmp.eq.s32.totalorder %v73_v42, %v1866_v55  ;;  %vm221_vm11 = vcmp.eq.s32.totalorder %v129_v43, %v1849_v44  ;;  %vm192_vm12 = vcmp.eq.s32.totalorder %v73_v42, %v1869_v56 }
  0xb8   :  { %v717_v5 = vsel %vm189_vm7, %v412_v8, 0.0  ;;  %v718_v48 = vsel %vm190_vm8, %v416_v11, 0.0  ;;  %vm222_vm13 = vcmp.eq.s32.totalorder %v129_v43, %v1860_v53  ;;  %v779_v58 = vadd.f32 %v778_v4, %v716_v36 }
  0xb9   :  { %v136_v0 = vpop.permute.xlu1 %135  ;;  %v80_v6 = vpop.permute.xlu0 %79  ;;  %v818_v40 = vadd.f32 %v817_v47, %v747_v63  ;;  %v782_v46 = vadd.f32 %v718_v48, %v717_v5  ;;  %v748_v59 = vsel %vm220_vm9, %v536_v7, 0.0  ;;  %v719_v42 = vsel %vm191_vm10, %v420_v12, 0.0 }
  0xba   :  { %v720_v8 = vsel %vm192_vm12, %v424_v14, 0.0  ;;  %v644_v11 = vrot.slane %v2028_v33, %v1813_v10  ;;  %vm193_vm14 = vcmp.eq.s32.totalorder %v80_v6, %v1849_v44  ;;  %780 = vadd.xlane.f32.xlu0 %v779_v58  ;;  %vm223_vm15 = vcmp.eq.s32.totalorder %v129_v43, %v1866_v55 }
  0xbb   :  { %v783_v47 = vadd.f32 %v782_v46, %v719_v42  ;;  %vm224_vm0 = vcmp.eq.s32.totalorder %v129_v43, %v1869_v56  ;;  %vm194_vm1 = vcmp.eq.s32.totalorder %v80_v6, %v1860_v53  ;;  %v749_v52 = vsel %vm221_vm11, %v540_v17, 0.0 }
  0xbc   :  { %v750_v54 = vsel %vm222_vm13, %v544_v18, 0.0  ;;  %v751_v7 = vsel %vm223_vm15, %v548_v23, 0.0  ;;  %v819_v60 = vadd.f32 %v818_v40, %v748_v59  ;;  %v648_v4 = vrot.slane %v2028_v33, %v1818_v13 }
  0xbd   :  { %v2113_v12 = vpop.permute.xlu1 %142  ;;  %v87_v14 = vpop.permute.xlu0 %86  ;;  %v784_v36 = vadd.f32 %v783_v47, %v720_v8  ;;  %v822_v63 = vadd.f32 %v750_v54, %v749_v52  ;;  %vm225_vm2 = vcmp.eq.s32.totalorder %v136_v0, %v1849_v44  ;;  %vm226_vm3 = vcmp.eq.s32.totalorder %v136_v0, %v1860_v53 }
  0xbe   :  { %v752_v17 = vsel %vm224_vm0, %v552_v24, 0.0  ;;  %vm195_vm4 = vcmp.eq.s32.totalorder %v80_v6, %v1866_v55  ;;  %820 = vadd.xlane.f32.xlu0 %v819_v60  ;;  %vm196_vm5 = vcmp.eq.s32.totalorder %v80_v6, %v1869_v56  ;;  %v721_v23 = vsel %vm193_vm14, %v428_v28, 0.0 }
  0xbf   :  { %785 = vadd.xlane.f32.xlu1 %v784_v36  ;;  %v823_v18 = vadd.f32 %v822_v63, %v751_v7  ;;  %v722_v61 = vsel %vm194_vm1, %v432_v29, 0.0  ;;  %vm197_vm6 = vcmp.eq.s32.totalorder %v87_v14, %v1849_v44  ;;  %vm198_vm7 = vcmp.eq.s32.totalorder %v87_v14, %v1860_v53 }
  0xc0   :  { %v787_v24 = vadd.f32 %v722_v61, %v721_v23  ;;  %vm227_vm8 = vcmp.eq.s32.totalorder %v136_v0, %v1866_v55  ;;  %vm228_vm9 = vcmp.eq.s32.totalorder %v136_v0, %v1869_v56  ;;  %v753_v28 = vsel %vm225_vm2, %v556_v32, 0.0 }
  0xc1   :  { %v2137_v43 = vpop.permute.xlu1 %149  ;;  %v2139_v5 = vpop.permute.xlu0 %93  ;;  %v824_v48 = vadd.f32 %v823_v18, %v752_v17  ;;  %v754_v29 = vsel %vm226_vm3, %v560_v34, 0.0  ;;  %vm229_vm10 = vcmp.eq.s32.totalorder %v2113_v12, %v1849_v44  ;;  %vm230_vm11 = vcmp.eq.s32.totalorder %v2113_v12, %v1860_v53 }
  0xc2   :  { %v723_v58 = vsel %vm195_vm4, %v436_v30, 0.0  ;;  %v755_v32 = vsel %vm227_vm8, %v564_v35, 0.0  ;;  %v724_v34 = vsel %vm196_vm5, %v440_v31, 0.0  ;;  %v827_v40 = vadd.f32 %v754_v29, %v753_v28 }
  0xc3   :  { %825 = vadd.xlane.f32.xlu0 %v824_v48  ;;  %v788_v0 = vadd.f32 %v787_v24, %v723_v58  ;;  %vm199_vm12 = vcmp.eq.s32.totalorder %v87_v14, %v1866_v55  ;;  %vm233_vm13 = vcmp.eq.s32.totalorder %v2137_v43, %v1849_v44  ;;  %v756_v30 = vsel %vm228_vm9, %v568_v37, 0.0 }
  0xc4   :  { %v725_v9 = vsel %vm197_vm6, %v444_v38, 0.0  ;;  %v726_v31 = vsel %vm198_vm7, %v448_v41, 0.0  ;;  %v828_v59 = vadd.f32 %v827_v40, %v755_v32  ;;  %vm200_vm14 = vcmp.eq.s32.totalorder %v87_v14, %v1869_v56 }
  0xc5   :  { %v789_v35 = vadd.f32 %v788_v0, %v724_v34  ;;  %v2185_v6 = vpop.permute.xlu1 %156  ;;  %v2187_v46 = vpop.permute.xlu0 %100  ;;  %v792_v15 = vadd.f32 %v726_v31, %v725_v9  ;;  %vm234_vm15 = vcmp.eq.s32.totalorder %v2137_v43, %v1860_v53  ;;  %vm201_vm0 = vcmp.eq.s32.totalorder %v2139_v5, %v1849_v44 }
  0xc6   :  { %vm202_vm1 = vcmp.eq.s32.totalorder %v2139_v5, %v1860_v53  ;;  %v2716_v37 = vrot.slane %v1914_v20, %v1813_v10  ;;  %v829_v41 = vadd.f32 %v828_v59, %v756_v30  ;;  %vm231_vm2 = vcmp.eq.s32.totalorder %v2113_v12, %v1866_v55 }
  0xc7   :  { %790 = vadd.xlane.f32.xlu1 %v789_v35  ;;  %vm232_vm3 = vcmp.eq.s32.totalorder %v2113_v12, %v1869_v56  ;;  %v2717_v8 = vrot.slane %v1914_v20, %v1818_v13  ;;  %v2718_v52 = vrot.slane %v1922_v26, %v1803_v2  ;;  %v2719_v7 = vrot.slane %v1922_v26, %v1806_v3 }
  0xc8   :  { %v727_v38 = vsel %vm199_vm12, %v2716_v37, 0.0  ;;  %v2720_v60 = vrot.slane %v1922_v26, %v1813_v10  ;;  %vm237_vm4 = vcmp.eq.s32.totalorder %v2185_v6, %v1849_v44  ;;  %vm238_vm5 = vcmp.eq.s32.totalorder %v2185_v6, %v1860_v53  ;;  %830 = vadd.xlane.f32.xlu0 %v829_v41 }
  0xc9   :  { %v793_v42 = vadd.f32 %v792_v15, %v727_v38  ;;  %v728_v47 = vsel %vm200_vm14, %v2717_v8, 0.0  ;;  %v757_v54 = vsel %vm229_vm10, %v2718_v52, 0.0  ;;  %v758_v14 = vsel %vm230_vm11, %v2719_v7, 0.0  ;;  %v2225_v63 = vpop.permute.xlu1 %163  ;;  %v2227_v17 = vpop.permute.xlu0 %107 }
  0xca   :  { %v759_v36 = vsel %vm231_vm2, %v2720_v60, 0.0  ;;  %v832_v18 = vadd.f32 %v758_v14, %v757_v54  ;;  %vm205_vm6 = vcmp.eq.s32.totalorder %v2187_v46, %v1849_v44  ;;  %vm206_vm7 = vcmp.eq.s32.totalorder %v2187_v46, %v1860_v53 }
  0xcb   :  { %v794_v20 = vadd.f32 %v793_v42, %v728_v47  ;;  %v2721_v12 = vrot.slane %v1922_v26, %v1818_v13  ;;  %vm203_vm8 = vcmp.eq.s32.totalorder %v2139_v5, %v1866_v55  ;;  %vm204_vm9 = vcmp.eq.s32.totalorder %v2139_v5, %v1869_v56 }
  0xcc   :  { %v833_v61 = vadd.f32 %v832_v18, %v759_v36  ;;  %v2722_v24 = vrot.slane %v1925_v27, %v1803_v2  ;;  %v2723_v28 = vrot.slane %v1925_v27, %v1806_v3  ;;  %vm241_vm10 = vcmp.eq.s32.totalorder %v2225_v63, %v1849_v44 }
  0xcd   :  { %v760_v23 = vsel %vm232_vm3, %v2721_v12, 0.0  ;;  %795 = vadd.xlane.f32.xlu1 %v794_v20  ;;  %vm242_vm11 = vcmp.eq.s32.totalorder %v2225_v63, %v1860_v53  ;;  %vm209_vm12 = vcmp.eq.s32.totalorder %v2227_v17, %v1849_v44  ;;  %vm235_vm14 = vcmp.eq.s32.totalorder %v2137_v43, %v1866_v55  ;;  %v2265_v0 = vpop.permute.xlu1 %170  ;;  %v2267_v40 = vpop.permute.xlu0 %114 }
  0xce   :  { %v729_v48 = vsel %vm201_vm0, %v2722_v24, 0.0  ;;  %v730_v26 = vsel %vm202_vm1, %v2723_v28, 0.0  ;;  %vm236_vm0 = vcmp.eq.s32.totalorder %v2137_v43, %v1869_v56  ;;  %v834_v58 = vadd.f32 %v833_v61, %v760_v23 }
  0xcf   :  { %v797_v29 = vadd.f32 %v730_v26, %v729_v48  ;;  %v2724_v32 = vrot.slane %v1925_v27, %v1813_v10  ;;  %v2725_v30 = vrot.slane %v1946_v39, %v1803_v2  ;;  %v2726_v31 = vrot.slane %v1946_v39, %v1806_v3 }
  0xd0   :  { %vm210_vm1 = vcmp.eq.s32.totalorder %v2227_v17, %v1860_v53  ;;  %v2727_v59 = vrot.slane %v1925_v27, %v1818_v13  ;;  %v2728_v38 = vrot.slane %v1946_v39, %v1813_v10  ;;  %835 = vadd.xlane.f32.xlu0 %v834_v58  ;;  %v2729_v43 = vrot.slane %v1946_v39, %v1818_v13 }
  0xd1   :  { %v731_v34 = vsel %vm203_vm8, %v2724_v32, 0.0  ;;  %v761_v9 = vsel %vm233_vm13, %v2725_v30, 0.0  ;;  %v762_v35 = vsel %vm234_vm15, %v2726_v31, 0.0  ;;  %vm213_vm13 = vcmp.eq.s32.totalorder %v2267_v40, %v1849_v44 }
  0xd2   :  { %v732_v15 = vsel %vm204_vm9, %v2727_v59, 0.0  ;;  %v798_v37 = vadd.f32 %v797_v29, %v731_v34  ;;  %v763_v41 = vsel %vm235_vm14, %v2728_v38, 0.0  ;;  %v764_v42 = vsel %vm236_vm0, %v2729_v43, 0.0 }
  0xd3   :  { %v837_v8 = vadd.f32 %v762_v35, %v761_v9  ;;  %vm207_vm15 = vcmp.eq.s32.totalorder %v2187_v46, %v1866_v55  ;;  %vm245_vm2 = vcmp.eq.s32.totalorder %v2265_v0, %v1849_v44  ;;  %vm246_vm3 = vcmp.eq.s32.totalorder %v2265_v0, %v1860_v53 }
  0xd4   :  { %v799_v27 = vadd.f32 %v798_v37, %v732_v15  ;;  %vm208_vm8 = vcmp.eq.s32.totalorder %v2187_v46, %v1869_v56  ;;  %v2730_v5 = vrot.slane %v1973_v62, %v1803_v2  ;;  %v2731_v47 = vrot.slane %v1973_v62, %v1806_v3 }
  0xd5   :  { %vm214_vm9 = vcmp.eq.s32.totalorder %v2267_v40, %v1860_v53  ;;  %v838_v54 = vadd.f32 %v837_v8, %v763_v41  ;;  %v2732_v7 = vrot.slane %v1973_v62, %v1813_v10  ;;  %vm240_vm14 = vcmp.eq.s32.totalorder %v2185_v6, %v1869_v56 }
  0xd6   :  { %v733_v39 = vsel %vm205_vm6, %v2730_v5, 0.0  ;;  %v734_v52 = vsel %vm206_vm7, %v2731_v47, 0.0  ;;  %800 = vadd.xlane.f32.xlu1 %v799_v27  ;;  %vm239_vm6 = vcmp.eq.s32.totalorder %v2185_v6, %v1866_v55  ;;  %v2733_v46 = vrot.slane %v1982_v51, %v1803_v2 }
  0xd7   :  { %v735_v14 = vsel %vm207_vm15, %v2732_v7, 0.0  ;;  %v802_v60 = vadd.f32 %v734_v52, %v733_v39  ;;  %v2734_v20 = vrot.slane %v1982_v51, %v1806_v3  ;;  %v839_v12 = vadd.f32 %v838_v54, %v764_v42 }
  0xd8   :  { %v765_v36 = vsel %vm237_vm4, %v2733_v46, 0.0  ;;  %v2735_v23 = vrot.slane %v1973_v62, %v1818_v13  ;;  %v2736_v48 = vrot.slane %v1982_v51, %v1813_v10  ;;  %vm211_vm4 = vcmp.eq.s32.totalorder %v2227_v17, %v1866_v55 }
  0xd9   :  { %v766_v18 = vsel %vm238_vm5, %v2734_v20, 0.0  ;;  %v803_v24 = vadd.f32 %v802_v60, %v735_v14  ;;  %vm212_vm7 = vcmp.eq.s32.totalorder %v2227_v17, %v1869_v56  ;;  %v2737_v6 = vrot.slane %v1956_v45, %v1803_v2  ;;  %840 = vadd.xlane.f32.xlu0 %v839_v12 }
  0xda   :  { %v736_v61 = vsel %vm208_vm8, %v2735_v23, 0.0  ;;  %v767_v28 = vsel %vm239_vm6, %v2736_v48, 0.0  ;;  %v842_v26 = vadd.f32 %v766_v18, %v765_v36  ;;  %v2738_v58 = vrot.slane %v1982_v51, %v1818_v13 }
  0xdb   :  { %v737_v62 = vsel %vm209_vm12, %v2737_v6, 0.0  ;;  %v804_v29 = vadd.f32 %v803_v24, %v736_v61  ;;  %v2739_v34 = vrot.slane %v1956_v45, %v1806_v3  ;;  %v2740_v9 = vrot.slane %v1956_v45, %v1813_v10 }
  0xdc   :  { %v768_v32 = vsel %vm240_vm14, %v2738_v58, 0.0  ;;  %v843_v35 = vadd.f32 %v842_v26, %v767_v28  ;;  %vm243_vm5 = vcmp.eq.s32.totalorder %v2225_v63, %v1866_v55  ;;  %vm244_vm12 = vcmp.eq.s32.totalorder %v2225_v63, %v1869_v56 }
  0xdd   :  { %v738_v30 = vsel %vm210_vm1, %v2739_v34, 0.0  ;;  %v739_v31 = vsel %vm211_vm4, %v2740_v9, 0.0  ;;  %805 = vadd.xlane.f32.xlu1 %v804_v29  ;;  %v2741_v51 = vrot.slane %v1956_v45, %v1818_v13  ;;  %v2742_v17 = vrot.slane %v1992_v21, %v1803_v2 }
  0xde   :  { %v807_v59 = vadd.f32 %v738_v30, %v737_v62  ;;  %v2743_v38 = vrot.slane %v1992_v21, %v1806_v3  ;;  %v2744_v43 = vrot.slane %v1992_v21, %v1813_v10  ;;  %v844_v45 = vadd.f32 %v843_v35, %v768_v32 }
  0xdf   :  { %v740_v15 = vsel %vm212_vm7, %v2741_v51, 0.0  ;;  %v769_v37 = vsel %vm241_vm10, %v2742_v17, 0.0  ;;  %vm215_vm0 = vcmp.eq.s32.totalorder %v2267_v40, %v1866_v55  ;;  %v2745_v5 = vrot.slane %v1992_v21, %v1818_v13 }
  0xe0   :  { %v770_v41 = vsel %vm242_vm11, %v2743_v38, 0.0  ;;  %v771_v42 = vsel %vm243_vm5, %v2744_v43, 0.0  ;;  %v808_v8 = vadd.f32 %v807_v59, %v739_v31  ;;  %vm216_vm10 = vcmp.eq.s32.totalorder %v2267_v40, %v1869_v56  ;;  %845 = vadd.xlane.f32.xlu0 %v844_v45 }
  0xe1   :  { %v847_v27 = vadd.f32 %v770_v41, %v769_v37  ;;  %v772_v39 = vsel %vm244_vm12, %v2745_v5, 0.0  ;;  %v2746_v63 = vrot.slane %v2002_v57, %v1803_v2  ;;  %v2747_v52 = vrot.slane %v2002_v57, %v1806_v3 }
  0xe2   :  { %v809_v21 = vadd.f32 %v808_v8, %v740_v15  ;;  %v2748_v14 = vrot.slane %v2002_v57, %v1813_v10  ;;  %vm247_vm11 = vcmp.eq.s32.totalorder %v2265_v0, %v1866_v55  ;;  %vm248_vm1 = vcmp.eq.s32.totalorder %v2265_v0, %v1869_v56 }
  0xe3   :  { %v741_v47 = vsel %vm213_vm13, %v2746_v63, 0.0  ;;  %v742_v54 = vsel %vm214_vm9, %v2747_v52, 0.0  ;;  %v848_v7 = vadd.f32 %v847_v27, %v771_v42  ;;  %v773_v36 = vsel %vm245_vm2, %v636_v49, 0.0 }
  0xe4   :  { %v743_v60 = vsel %vm215_vm0, %v2748_v14, 0.0  ;;  %v812_v46 = vadd.f32 %v742_v54, %v741_v47  ;;  %v774_v20 = vsel %vm246_vm3, %v640_v50, 0.0  ;;  %810 = vadd.xlane.f32.xlu1 %v809_v21  ;;  %v775_v12 = vsel %vm247_vm11, %v644_v11, 0.0 }
  0xe5   :  { %v849_v18 = vadd.f32 %v848_v7, %v772_v39  ;;  %v2749_v23 = vrot.slane %v2002_v57, %v1818_v13  ;;  %v852_v61 = vadd.f32 %v774_v20, %v773_v36  ;;  %v776_v53 = vsel %vm248_vm1, %v648_v4, 0.0 }
  0xe6   :  { %v813_v55 = vadd.f32 %v812_v46, %v743_v60  ;;  %v2460_v62 = vsub.s32 %v1849_v44, %v1800_v1  ;;  %vm953_vm13 = vcmask 1041409   ;;  %vm955_vm15 = vcmask 1042434  }
  0xe7   :  { %v744_v49 = vsel %vm216_vm10, %v2749_v23, 0.0  ;;  %850 = vadd.xlane.f32.xlu0 %v849_v18  ;;  %v853_v50 = vadd.f32 %v852_v61, %v775_v12  ;;  %vm957_vm2 = vcmask 1043459   ;;  %vm959_vm3 = vcmask 1044484  }
  0xe8   :  { %v814_v24 = vadd.f32 %v813_v55, %v744_v49  ;;  %vm961_vm8 = vcmask 1045509   ;;  %vm963_vm9 = vcmask 1046534   ;;  %vm965_vm6 = vcmask 1047559  }
  0xe9   :  { %v854_v0 = vadd.f32 %v853_v50, %v776_v53  ;;  %vm976_vm14 = vcmask 64512   ;;  %v1736_v23 = vmov 0  }
  0xea   :  { %815 = vadd.xlane.f32.xlu1 %v814_v24  ;;  %1581 = vset.pattern.permute.xlu0 %v1736_v23 }
  0xeb   :  { %855 = vadd.xlane.f32.xlu0 %v854_v0  ;;  %1580 = vset.pattern.permute.xlu1 %v1736_v23 }
 0x147   :  { %v2438_v48 = vpop.xlane.xlu0 %780 }
 0x148   :  { %v892_v30 = vrot.slane %v2438_v48, %v2460_v62 }
 0x14b   :  { %v2440_v11 = vpop.xlane.xlu0 %820 }
 0x14c   :  { %v2442_v57 = vpop.xlane.xlu1 %785  ;;  %v924_v15 = vrot.slane %v2440_v11, %v2460_v62 }
 0x14d   :  { %v896_v58 = vrot.slane %v2442_v57, %v2460_v62 }
 0x14f   :  { %v954_v35 = vsel %vm953_vm13, %v896_v58, %v892_v30 }
 0x150   :  { %v2444_v28 = vpop.xlane.xlu0 %825 }
 0x151   :  { %v928_v1 = vrot.slane %v2444_v28, %v2460_v62 }
 0x153   :  { %v967_v45 = vsel %vm953_vm13, %v928_v1, %v924_v15 }
 0x154   :  { %v2446_v56 = vpop.xlane.xlu1 %790 }
 0x155   :  { %v2448_v40 = vpop.xlane.xlu0 %830  ;;  %v900_v32 = vrot.slane %v2446_v56, %v2460_v62 }
 0x156   :  { %v932_v59 = vrot.slane %v2448_v40, %v2460_v62 }
 0x157   :  { %v956_v17 = vsel %vm955_vm15, %v900_v32, %v954_v35 }
 0x158   :  { %v968_v39 = vsel %vm955_vm15, %v932_v59, %v967_v45 }
 0x15a   :  { %v2450_v26 = vpop.xlane.xlu1 %795 }
 0x15b   :  { %v904_v9 = vrot.slane %v2450_v26, %v2460_v62 }
 0x15d   :  { %v2452_v33 = vpop.xlane.xlu0 %835  ;;  %v958_v43 = vsel %vm957_vm2, %v904_v9, %v956_v17 }
 0x15e   :  { %v936_v37 = vrot.slane %v2452_v33, %v2460_v62 }
 0x160   :  { %v969_v54 = vsel %vm957_vm2, %v936_v37, %v968_v39 }
 0x163   :  { %v2454_v4 = vpop.xlane.xlu1 %800 }
 0x164   :  { %v908_v44 = vrot.slane %v2454_v4, %v2460_v62 }
 0x166   :  { %v2456_v6 = vpop.xlane.xlu0 %840  ;;  %v960_v8 = vsel %vm959_vm3, %v908_v44, %v958_v43 }
 0x167   :  { %v940_v42 = vrot.slane %v2456_v6, %v2460_v62 }
 0x169   :  { %v970_v7 = vsel %vm959_vm3, %v940_v42, %v969_v54 }
 0x16a   :  { %v806_v29 = vpop.xlane.xlu1 %805 }
 0x16b   :  { %v912_v51 = vrot.slane %v806_v29, %v2460_v62 }
 0x16d   :  { %v2466_v34 = vpop.xlane.xlu0 %845  ;;  %v962_v52 = vsel %vm961_vm8, %v912_v51, %v960_v8 }
 0x16e   :  { %v944_v27 = vrot.slane %v2466_v34, %v2460_v62 }
 0x170   :  { %v971_v20 = vsel %vm961_vm8, %v944_v27, %v970_v7 }
 0x171   :  { %v811_v31 = vpop.xlane.xlu1 %810 }
 0x172   :  { %v916_v38 = vrot.slane %v811_v31, %v2460_v62 }
 0x174   :  { %v2486_v41 = vpop.xlane.xlu0 %850  ;;  %v964_v21 = vsel %vm963_vm9, %v916_v38, %v962_v52 }
 0x175   :  { %v948_v47 = vrot.slane %v2486_v41, %v2460_v62 }
 0x177   :  { %v816_v5 = vpop.xlane.xlu1 %815  ;;  %v972_v18 = vsel %vm963_vm9, %v948_v47, %v971_v20 }
 0x178   :  { %v920_v63 = vrot.slane %v816_v5, %v2460_v62  ;;  %v2503_v14 = vpop.xlane.xlu0 %855 }
 0x179   :  { %v952_v46 = vrot.slane %v2503_v14, %v2460_v62 }
 0x17a   :  { %v966_v60 = vsel %vm965_vm6, %v920_v63, %v964_v21 }
 0x17b   :  { %v977_v36 = vsel %vm976_vm14, %v966_v60, -inf  ;;  %v973_v55 = vsel %vm965_vm6, %v952_v46, %v972_v18 }
 0x17c   :  { %978 = vmax.xlane.f32.xlu1 %v977_v36  ;;  %v980_v12 = vsel %vm976_vm14, %v973_v55, -inf }
 0x17d   :  { %981 = vmax.xlane.f32.xlu0 %v980_v12 }
 0x209   :  { %v979_v49 = vpop.xlane.xlu1 %978 }
 0x20a   :  { %v988_v61 = vrot.slane %v979_v49, %v1803_v2  ;;  %v992_v24 = vrot.slane %v979_v49, %v1806_v3  ;;  %v2518_v50 = vpop.xlane.xlu0 %981  ;;  %v1008_v0 = vrot.slane %v979_v49, %v1828_v19  ;;  %v1012_v1 = vrot.slane %v979_v49, %v1833_v22 }
 0x20b   :  { %v1020_v32 = vrot.slane %v2518_v50, %v1803_v2  ;;  %v1024_v9 = vrot.slane %v2518_v50, %v1806_v3  ;;  %v1016_v15 = vrot.slane %v979_v49, %v1838_v25  ;;  %v1032_v39 = vrot.slane %v2518_v50, %v1818_v13 }
 0x20c   :  { %v2516_v53 = vsub.f32 %v2438_v48, %v988_v61  ;;  %v2522_v58 = vsub.f32 %v2442_v57, %v992_v24  ;;  %v2530_v44 = vsub.f32 %v806_v29, %v1008_v0  ;;  %v996_v57 = vrot.slane %v979_v49, %v1813_v10 }
 0x20d   :  { %v2534_v35 = vsub.f32 %v2440_v11, %v1020_v32  ;;  %v2538_v59 = vsub.f32 %v2444_v28, %v1024_v9  ;;  %v2542_v17 = vsub.f32 %v811_v31, %v1012_v1  ;;  %v1028_v11 = vrot.slane %v2518_v50, %v1813_v10 }
 0x20e   :  { %v1081_v30 = vmul.f32 1.442695, %v2516_v53  ;;  %v1083_v48 = vmul.f32 1.442695, %v2522_v58  ;;  %v1091_v29 = vmul.f32 1.442695, %v2530_v44  ;;  %v2546_v37 = vsub.f32 %v2446_v56, %v996_v57 }
 0x20f   :  { %v1097_v51 = vmul.f32 1.442695, %v2534_v35  ;;  %v1099_v28 = vmul.f32 1.442695, %v2538_v59  ;;  %v2551_v38 = vsub.f32 %v816_v5, %v1016_v15  ;;  %v1093_v43 = vmul.f32 1.442695, %v2542_v17 }
 0x210   :  { %1594 = vpow2.f32 %v1081_v30  ;;  %v1000_v31 = vrot.slane %v979_v49, %v1818_v13  ;;  %v1085_v42 = vmul.f32 1.442695, %v2546_v37  ;;  %v2557_v45 = vsub.f32 %v2448_v40, %v1028_v11 }
 0x211   :  { %1596 = vpow2.f32 %v1083_v48  ;;  %v1095_v56 = vmul.f32 1.442695, %v2551_v38  ;;  %v1004_v52 = vrot.slane %v979_v49, %v1823_v16  ;;  %v2569_v21 = vsub.f32 %v2452_v33, %v1032_v39 }
 0x212   :  { %1598 = vpow2.f32 %v1097_v51  ;;  %v2561_v5 = vsub.f32 %v2450_v26, %v1000_v31  ;;  %v1101_v63 = vmul.f32 1.442695, %v2557_v45  ;;  %v1036_v46 = vrot.slane %v2518_v50, %v1823_v16 }
 0x213   :  { %1600 = vpow2.f32 %v1091_v29  ;;  %v2572_v60 = vsub.f32 %v2454_v4, %v1004_v52  ;;  %v1103_v36 = vmul.f32 1.442695, %v2569_v21  ;;  %v1040_v55 = vrot.slane %v2518_v50, %v1828_v19 }
 0x214   :  { %1602 = vpow2.f32 %v1099_v28  ;;  %v1087_v54 = vmul.f32 1.442695, %v2561_v5  ;;  %v2581_v12 = vsub.f32 %v2456_v6, %v1036_v46  ;;  %v1044_v23 = vrot.slane %v2518_v50, %v1833_v22 }
 0x215   :  { %1604 = vpow2.f32 %v1093_v43  ;;  %v1089_v33 = vmul.f32 1.442695, %v2572_v60  ;;  %v2586_v49 = vsub.f32 %v2466_v34, %v1040_v55  ;;  %v1048_v0 = vrot.slane %v2518_v50, %v1838_v25 }
 0x216   :  { %1606 = vpow2.f32 %v1085_v42  ;;  %v1105_v61 = vmul.f32 1.442695, %v2581_v12  ;;  %v2592_v6 = vsub.f32 %v2486_v41, %v1044_v23 }
 0x217   :  { %1608 = vpow2.f32 %v1095_v56  ;;  %v1107_v32 = vmul.f32 1.442695, %v2586_v49  ;;  %v2596_v9 = vsub.f32 %v2503_v14, %v1048_v0 }
 0x218   :  { %1610 = vpow2.f32 %v1101_v63  ;;  %v1109_v34 = vmul.f32 1.442695, %v2592_v6 }
 0x219   :  { %1612 = vpow2.f32 %v1087_v54  ;;  %v1111_v48 = vmul.f32 1.442695, %v2596_v9 }
 0x21a   :  { %v1595_v8 = vpop.eup %1594  ;;  %1614 = vpow2.f32 %v1103_v36 }
 0x21b   :  { %v1597_v27 = vpop.eup %1596  ;;  %1130 = vperm.xlu1 %1580, %v1595_v8   ;;  %1616 = vpow2.f32 %v1089_v33 }
 0x21c   :  { %1133 = vperm.xlu0 %1581, %v1597_v27   ;;  %v1599_v47 = vpop.eup %1598  ;;  %1618 = vpow2.f32 %v1105_v61 }
 0x21d   :  { %v1601_v40 = vpop.eup %1600  ;;  %1620 = vpow2.f32 %v1107_v32 }
 0x21e   :  { %v1603_v26 = vpop.eup %1602  ;;  %1622 = vpow2.f32 %v1109_v34 }
 0x21f   :  { %1154 = vperm.xlu1 %1580, %v1599_v47   ;;  %v1605_v7 = vpop.eup %1604  ;;  %1624 = vpow2.f32 %v1111_v48 }
 0x220   :  { %1145 = vperm.xlu0 %1581, %v1601_v40   ;;  %v1607_v20 = vpop.eup %1606 }
 0x221   :  { %v1609_v18 = vpop.eup %1608 }
 0x222   :  { %v1611_v4 = vpop.eup %1610 }
 0x223   :  { %1157 = vperm.xlu1 %1580, %v1603_v26   ;;  %v1613_v24 = vpop.eup %1612 }
 0x224   :  { %1148 = vperm.xlu0 %1581, %v1605_v7   ;;  %v1615_v30 = vpop.eup %1614 }
 0x225   :  { %v1617_v1 = vpop.eup %1616 }
 0x226   :  { %v1619_v50 = vpop.eup %1618 }
 0x227   :  { %1136 = vperm.xlu1 %1580, %v1607_v20   ;;  %v1621_v41 = vpop.eup %1620 }
 0x228   :  { %1151 = vperm.xlu0 %1581, %v1609_v18   ;;  %v1623_v57 = vpop.eup %1622 }
 0x229   :  { %v1625_v51 = vpop.eup %1624 }
 0x22b   :  { %1160 = vperm.xlu1 %1580, %v1611_v4  }
 0x22f   :  { %1139 = vperm.xlu1 %1580, %v1613_v24  }
 0x233   :  { %1163 = vperm.xlu1 %1580, %v1615_v30  }
 0x237   :  { %1142 = vperm.xlu1 %1580, %v1617_v1  }
 0x23b   :  { %1166 = vperm.xlu1 %1580, %v1619_v50  }
 0x23f   :  { %1169 = vperm.xlu1 %1580, %v1621_v41  }
 0x243   :  { %1172 = vperm.xlu1 %1580, %v1623_v57  }
 0x247   :  { %1175 = vperm.xlu1 %1580, %v1625_v51  }
 0x29a   :  { %v1131_v15 = vpop.permute.xlu1 %1130 }
 0x29b   :  { %v1134_v11 = vpop.permute.xlu0 %1133  ;;  %v1180_v8 = vrot.slane %v1131_v15, %v2460_v62 }
 0x29c   :  { %v1184_v27 = vrot.slane %v1134_v11, %v2460_v62 }
 0x29e   :  { %v1155_v14 = vpop.permute.xlu1 %1154  ;;  %v1241_v40 = vsel %vm953_vm13, %v1184_v27, %v1180_v8 }
 0x29f   :  { %v1146_v31 = vpop.permute.xlu0 %1145  ;;  %v1212_v34 = vrot.slane %v1155_v14, %v2460_v62 }
 0x2a0   :  { %v1200_v46 = vrot.slane %v1146_v31, %v2460_v62 }
 0x2a2   :  { %v1158_v29 = vpop.permute.xlu1 %1157 }
 0x2a3   :  { %v1149_v56 = vpop.permute.xlu0 %1148  ;;  %v1216_v32 = vrot.slane %v1158_v29, %v2460_v62 }
 0x2a4   :  { %v1204_v20 = vrot.slane %v1149_v56, %v2460_v62 }
 0x2a5   :  { %v1248_v41 = vsel %vm953_vm13, %v1216_v32, %v1212_v34  ;;  %v58_v34 = vld [vmem:[#allocation7] sm:$0xff] }
 0x2a6   :  { %v1137_v28 = vpop.permute.xlu1 %1136  ;;  %vm1372_vm4 = vcmp.gt.f32.partialorder %v58_v34, 0.0 }
 0x2a7   :  { %v1188_v63 = vrot.slane %v1137_v28, %v2460_v62  ;;  %v1152_v26 = vpop.permute.xlu0 %1151 }
 0x2a8   :  { %v1208_v33 = vrot.slane %v1152_v26, %v2460_v62 }
 0x2a9   :  { %v1242_v54 = vsel %vm955_vm15, %v1188_v63, %v1241_v40 }
 0x2aa   :  { %v1161_v43 = vpop.permute.xlu1 %1160 }
 0x2ab   :  { %v1220_v30 = vrot.slane %v1161_v43, %v2460_v62 }
 0x2ad   :  { %v1249_v51 = vsel %vm955_vm15, %v1220_v30, %v1248_v41 }
 0x2ae   :  { %v1140_v42 = vpop.permute.xlu1 %1139 }
 0x2af   :  { %v1192_v47 = vrot.slane %v1140_v42, %v2460_v62 }
 0x2b1   :  { %v1243_v36 = vsel %vm957_vm2, %v1192_v47, %v1242_v54 }
 0x2b2   :  { %v1164_v39 = vpop.permute.xlu1 %1163 }
 0x2b3   :  { %v1224_v1 = vrot.slane %v1164_v39, %v2460_v62 }
 0x2b5   :  { %v1250_v11 = vsel %vm957_vm2, %v1224_v1, %v1249_v51 }
 0x2b6   :  { %v1143_v52 = vpop.permute.xlu1 %1142 }
 0x2b7   :  { %v1196_v7 = vrot.slane %v1143_v52, %v2460_v62 }
 0x2b9   :  { %v1244_v18 = vsel %vm959_vm3, %v1196_v7, %v1243_v36 }
 0x2ba   :  { %v1167_v55 = vpop.permute.xlu1 %1166  ;;  %v1245_v4 = vsel %vm961_vm8, %v1200_v46, %v1244_v18 }
 0x2bb   :  { %v1246_v23 = vsel %vm963_vm9, %v1204_v20, %v1245_v4  ;;  %v1228_v48 = vrot.slane %v1167_v55, %v2460_v62 }
 0x2bc   :  { %v1247_v61 = vsel %vm965_vm6, %v1208_v33, %v1246_v23 }
 0x2bd   :  { %v1257_v24 = vsel %vm976_vm14, %v1247_v61, 0.0  ;;  %v1251_v29 = vsel %vm959_vm3, %v1228_v48, %v1250_v11 }
 0x2be   :  { %v1170_v0 = vpop.permute.xlu1 %1169  ;;  %1258 = vadd.xlane.f32.xlu0 %v1257_v24 }
 0x2bf   :  { %v1232_v57 = vrot.slane %v1170_v0, %v2460_v62 }
 0x2c1   :  { %v1252_v14 = vsel %vm961_vm8, %v1232_v57, %v1251_v29 }
 0x2c2   :  { %v1173_v50 = vpop.permute.xlu1 %1172 }
 0x2c3   :  { %v1236_v15 = vrot.slane %v1173_v50, %v2460_v62 }
 0x2c5   :  { %v1253_v31 = vsel %vm963_vm9, %v1236_v15, %v1252_v14 }
 0x2c6   :  { %v1176_v28 = vpop.permute.xlu1 %1175 }
 0x2c7   :  { %v1240_v43 = vrot.slane %v1176_v28, %v2460_v62 }
 0x2c9   :  { %v1254_v42 = vsel %vm965_vm6, %v1240_v43, %v1253_v31 }
 0x2ca   :  { %v1260_v56 = vsel %vm976_vm14, %v1254_v42, 0.0 }
 0x2cb   :  { %1261 = vadd.xlane.f32.xlu1 %v1260_v56 }
 0x34b   :  { %v1259_v8 = vpop.xlane.xlu0 %1258 }
 0x34c   :  { %1626 = vlog2.f32 %v1259_v8 }
 0x356   :  { %v1627_v27 = vpop.eup %1626 }
 0x357   :  { %v1264_v39 = vmul.f32 0.6931472, %v1627_v27 }
 0x358   :  { %v1262_v63 = vpop.xlane.xlu1 %1261 }
 0x359   :  { %1628 = vlog2.f32 %v1262_v63  ;;  %v1276_v47 = vrot.slane %v1264_v39, %v1806_v3  ;;  %v1272_v40 = vrot.slane %v1264_v39, %v1803_v2  ;;  %v1280_v55 = vrot.slane %v1264_v39, %v1813_v10 }
 0x35b   :  { %v1350_v52 = vsub.f32 %v2522_v58, %v1276_v47  ;;  %v1349_v54 = vsub.f32 %v2516_v53, %v1272_v40  ;;  %v1351_v58 = vsub.f32 %v2546_v37, %v1280_v55 }
 0x35d   :  { %1408 = vperm.xlu1 %1580, %v1350_v52   ;;  %1405 = vperm.xlu0 %1581, %v1349_v54  }
 0x363   :  { %v1629_v26 = vpop.eup %1628 }
 0x364   :  { %v1266_v7 = vmul.f32 0.6931472, %v1629_v26 }
 0x366   :  { %v1308_v46 = vrot.slane %v1266_v7, %v1806_v3  ;;  %v1304_v36 = vrot.slane %v1266_v7, %v1803_v2  ;;  %v1312_v33 = vrot.slane %v1266_v7, %v1813_v10  ;;  %v1316_v4 = vrot.slane %v1266_v7, %v1818_v13 }
 0x367   :  { %v1284_v3 = vrot.slane %v1264_v39, %v1818_v13  ;;  %v1288_v10 = vrot.slane %v1264_v39, %v1823_v16  ;;  %v1324_v23 = vrot.slane %v1266_v7, %v1828_v19  ;;  %v1292_v13 = vrot.slane %v1264_v39, %v1828_v19 }
 0x368   :  { %v1358_v20 = vsub.f32 %v2538_v59, %v1308_v46  ;;  %v1357_v18 = vsub.f32 %v2534_v35, %v1304_v36  ;;  %v1359_v53 = vsub.f32 %v2557_v45, %v1312_v33  ;;  %v1360_v2 = vsub.f32 %v2569_v21, %v1316_v4 }
 0x369   :  { %v1352_v35 = vsub.f32 %v2561_v5, %v1284_v3  ;;  %v1320_v59 = vrot.slane %v1266_v7, %v1823_v16  ;;  %v1353_v37 = vsub.f32 %v2572_v60, %v1288_v10  ;;  %v1362_v21 = vsub.f32 %v2586_v49, %v1324_v23 }
 0x36a   :  { %1432 = vperm.xlu1 %1580, %v1358_v20   ;;  %1429 = vperm.xlu0 %1581, %v1357_v18   ;;  %v1354_v5 = vsub.f32 %v2530_v44, %v1292_v13  ;;  %v1328_v61 = vrot.slane %v1266_v7, %v1833_v22  ;;  %v1296_v16 = vrot.slane %v1264_v39, %v1833_v22 }
 0x36b   :  { %v1361_v45 = vsub.f32 %v2581_v12, %v1320_v59  ;;  %v1332_v24 = vrot.slane %v1266_v7, %v1838_v25  ;;  %v1300_v19 = vrot.slane %v1264_v39, %v1838_v25  ;;  %v1382_v25 = vsel %vm1372_vm4, %v58_v34, 1.0 }
 0x36c   :  { %v1363_v12 = vsub.f32 %v2592_v6, %v1328_v61  ;;  %v1355_v60 = vsub.f32 %v2542_v17, %v1296_v16  ;;  %v59_v6 = vld [vmem:[#allocation7 + $0x8] sm:$0xff]  ;;  %1630 = vlog2.f32 %v1382_v25 }
 0x36d   :  { %v1364_v49 = vsub.f32 %v2596_v9, %v1332_v24  ;;  %v1356_v44 = vsub.f32 %v2551_v38, %v1300_v19  ;;  %vm1373_vm7 = vcmp.gt.f32.partialorder %v59_v6, 0.0 }
 0x36e   :  { %1435 = vperm.xlu1 %1580, %v1359_v53   ;;  %1411 = vperm.xlu0 %1581, %v1351_v58   ;;  %v1383_v9 = vsel %vm1373_vm7, %v59_v6, 1.0 }
 0x36f   :  { %1632 = vlog2.f32 %v1383_v9 }
 0x372   :  { %1438 = vperm.xlu1 %1580, %v1360_v2   ;;  %1414 = vperm.xlu0 %1581, %v1352_v35  }
 0x376   :  { %1441 = vperm.xlu1 %1580, %v1361_v45   ;;  %1417 = vperm.xlu0 %1581, %v1353_v37   ;;  %v1631_v56 = vpop.eup %1630 }
 0x377   :  { %v1385_v3 = vmul.f32 0.6931472, %v1631_v56 }
 0x379   :  { %v1633_v47 = vpop.eup %1632 }
 0x37a   :  { %1444 = vperm.xlu1 %1580, %v1362_v21   ;;  %1420 = vperm.xlu0 %1581, %v1354_v5   ;;  %v1387_v2 = vmul.f32 0.6931472, %v1633_v47 }
 0x37e   :  { %1447 = vperm.xlu1 %1580, %v1363_v12   ;;  %1423 = vperm.xlu0 %1581, %v1355_v60  }
 0x382   :  { %1450 = vperm.xlu1 %1580, %v1364_v49   ;;  %1426 = vperm.xlu0 %1581, %v1356_v44  }
 0x3dc   :  { %v1409_v0 = vpop.permute.xlu1 %1408  ;;  %v1406_v22 = vpop.permute.xlu0 %1405 }
 0x3dd   :  { %v1459_v15 = vrot.slane %v1409_v0, %v2460_v62  ;;  %v1455_v11 = vrot.slane %v1406_v22, %v2460_v62 }
 0x3df   :  { %v1516_v40 = vsel %vm953_vm13, %v1459_v15, %v1455_v11 }
 0x3e9   :  { %v1433_v32 = vpop.permute.xlu1 %1432  ;;  %v1430_v30 = vpop.permute.xlu0 %1429 }
 0x3ea   :  { %v1491_v29 = vrot.slane %v1433_v32, %v2460_v62  ;;  %v1487_v28 = vrot.slane %v1430_v30, %v2460_v62 }
 0x3ec   :  { %v1523_v52 = vsel %vm953_vm13, %v1491_v29, %v1487_v28 }
 0x3ed   :  { %v1436_v1 = vpop.permute.xlu1 %1435  ;;  %v1412_v17 = vpop.permute.xlu0 %1411 }
 0x3ee   :  { %v1495_v14 = vrot.slane %v1436_v1, %v2460_v62  ;;  %v1463_v43 = vrot.slane %v1412_v17, %v2460_v62 }
 0x3f0   :  { %v1524_v7 = vsel %vm955_vm15, %v1495_v14, %v1523_v52  ;;  %v1517_v46 = vsel %vm955_vm15, %v1463_v43, %v1516_v40 }
 0x3f1   :  { %v1439_v48 = vpop.permute.xlu1 %1438  ;;  %v1415_v50 = vpop.permute.xlu0 %1414 }
 0x3f2   :  { %v1499_v31 = vrot.slane %v1439_v48, %v2460_v62  ;;  %v1467_v42 = vrot.slane %v1415_v50, %v2460_v62 }
 0x3f4   :  { %v1525_v18 = vsel %vm957_vm2, %v1499_v31, %v1524_v7  ;;  %v1518_v33 = vsel %vm957_vm2, %v1467_v42, %v1517_v46 }
 0x3f5   :  { %v1442_v38 = vpop.permute.xlu1 %1441  ;;  %v1418_v41 = vpop.permute.xlu0 %1417 }
 0x3f6   :  { %v1503_v8 = vrot.slane %v1442_v38, %v2460_v62  ;;  %v1471_v27 = vrot.slane %v1418_v41, %v2460_v62 }
 0x3f8   :  { %v1526_v55 = vsel %vm959_vm3, %v1503_v8, %v1525_v18  ;;  %v1519_v53 = vsel %vm959_vm3, %v1471_v27, %v1518_v33 }
 0x3f9   :  { %v1445_v57 = vpop.permute.xlu1 %1444  ;;  %v1421_v51 = vpop.permute.xlu0 %1420 }
 0x3fa   :  { %v1507_v54 = vrot.slane %v1445_v57, %v2460_v62  ;;  %v1475_v26 = vrot.slane %v1421_v51, %v2460_v62 }
 0x3fc   :  { %v1527_v35 = vsel %vm961_vm8, %v1507_v54, %v1526_v55  ;;  %v1520_v59 = vsel %vm961_vm8, %v1475_v26, %v1519_v53 }
 0x3fd   :  { %v1448_v39 = vpop.permute.xlu1 %1447  ;;  %v1424_v63 = vpop.permute.xlu0 %1423 }
 0x3fe   :  { %v1511_v36 = vrot.slane %v1448_v39, %v2460_v62  ;;  %v1479_v20 = vrot.slane %v1424_v63, %v2460_v62 }
 0x400   :  { %v1528_v37 = vsel %vm963_vm9, %v1511_v36, %v1527_v35  ;;  %v1521_v23 = vsel %vm963_vm9, %v1479_v20, %v1520_v59 }
 0x401   :  { %v1451_v58 = vpop.permute.xlu1 %1450  ;;  %v1427_v4 = vpop.permute.xlu0 %1426 }
 0x402   :  { %v1515_v10 = vrot.slane %v1451_v58, %v2460_v62  ;;  %v1483_v45 = vrot.slane %v1427_v4, %v2460_v62 }
 0x404   :  { %v1529_v13 = vsel %vm965_vm6, %v1515_v10, %v1528_v37  ;;  %v1522_v21 = vsel %vm965_vm6, %v1483_v45, %v1521_v23 }
 0x405   :  { %v1532_v5 = vsub.f32 %v1385_v3, %v1522_v21  ;;  %v1533_v61 = vsub.f32 %v1387_v2, %v1529_v13 }
 0x407   :  { %v1534_v16 = vmul.f32 %v1532_v5, %v58_v34  ;;  %v1535_v12 = vmul.f32 %v1533_v61, %v59_v6 }
 0x409   :  { %v1536_v60 = vsel %vm1372_vm4, %v1534_v16, 0.0  ;;  %v1537_v24 = vsel %vm1373_vm7, %v1535_v12, 0.0 }
 0x40a   :  { %v1538_v19 = vsel %vm976_vm14, %v1536_v60, 0.0  ;;  %v1539_v62 = vsel %vm976_vm14, %v1537_v24, 0.0 }
 0x40b   :  { %v1540_v49 = vadd.f32 %v1539_v62, %v1538_v19 }
 0x40d   :  { %1541 = vadd.xlane.f32.xlu0 %v1540_v49 }
 0x49a   :  { %v1542_v44 = vpop.xlane.xlu0 %1541 }
 0x49b   :  { %v1543_v0 = vrot.slane %v1542_v44, 4 }
 0x49d   :  { %v1544_v22 = vadd.f32 %v1543_v0, %v1542_v44 }
 0x49f   :  { %v1545_v32 = vrot.slane %v1544_v22, 2 }
 0x4a1   :  { %v1546_v30 = vadd.f32 %v1545_v32, %v1544_v22 }
 0x4a3   :  { %v1547_v1 = vrot.slane %v1546_v30, 1 }
 0x4a5   :  { %v1548_v17 = vadd.f32 %v1547_v1, %v1546_v30 }
 0x4a7   :  { %1568 = vpush %v1548_v17 }
 0x4d8   :  { %s1569_s23 = spop %1568 }
 0x4d9   :  { %v1550_v34 = vstv %s1569_s23 }
 0x4da   :  { %1551 = vst [vmem:[#allocation8] sm:$0xff] %v1550_v34 }
 0x4db   :  { %1711 = shalt.err (!%p1708_p0)
}
 0x4dc   :  { %s1712_s28 = scalar_lea.hbm %s2715_s3, 128 }
 0x4dd   :  { %p1713_p1 = scmp.ne.s32.totalorder %s2715_s3, %s1712_s28  ;;  %p1716_p2 = scmp.lt.u32.totalorder %s1712_s28, %s2715_s3 }
 0x4df   :  { %p1718_p3 = pnand %p1716_p2, %p1713_p1 }
 0x4e1   :  { %1721 = shalt.err (!%p1718_p3)
}
 0x4e2   :  { %1561 = dma.vmem_to_hbm [thread:$0]  %s1559_s22, 128, %s2715_s3, [#allocation4]  }
 0x4e3   :  { %1726 = dma.done.wait [#allocation4], 128  }
 0x4e4   :  { %1727 = vsyncadd [#allocation4], 4294967168 }
 0x4e5   :  { %1565 = vsyncpa [#allocation3], 1 }
 0x4e6   :  { %1566 = vsyncpa [#allocation6], 1 }
 0x4e7   :  { %1567 = vsyncpa [#allocation4], 1 }

</bundles_post_ra>
